<compile_context>
chip_gen: v7x
topology: tpu7x:2x2x1
jax: 0.10.0
libtpu: 0.0.40
codegen_flags: <defaults>
</compile_context>

<pallas_src>
import functools

import jax
import jax.numpy as jnp
from jax.experimental import pallas as pl
from jax.experimental.pallas import tpu as pltpu

_EPS = 1e-6  # matches torch.nn.functional.pairwise_distance default eps


def _contrastive_kernel(margin_ref, x1_ref, x2_ref, lab_ref, out_ref, acc_ref,
                        *, n_rows, block_rows, mask_partial):
    i = pl.program_id(0)

    @pl.when(i == 0)
    def _init():
        acc_ref[0] = jnp.float32(0.0)

    # Upcast in-kernel: HBM traffic stays at the native input dtype, math is f32.
    x1 = x1_ref[...].astype(jnp.float32)
    x2 = x2_ref[...].astype(jnp.float32)
    diff = x1 - x2 + jnp.float32(_EPS)                               # (TN, D)
    sq_dist = jnp.sum(diff * diff, axis=1, keepdims=True)            # (TN, 1)  lane-reduce (XLU)
    dist = jnp.sqrt(sq_dist)                                         # (TN, 1)
    hinge = jnp.maximum(margin_ref[0] - dist, 0.0)                   # clamp(margin - d, 0)
    per_row = lab_ref[...].astype(jnp.float32) * hinge * hinge       # (TN, 1)

    if mask_partial:
        # Mask rows past the true batch size (only the last grid step can be partial;
        # the mask is a no-op elsewhere and cheap enough to leave unconditional).
        row_ids = jax.lax.broadcasted_iota(jnp.int32, per_row.shape, 0) + i * block_rows
        per_row = jnp.where(row_ids < n_rows, per_row, 0.0)

    acc_ref[0] += jnp.sum(per_row)

    @pl.when(i == pl.num_programs(0) - 1)
    def _finalize():
        out_ref[0] = acc_ref[0] / jnp.float32(n_rows)


def _pick_block_rows(n, d, itemsize):
    """Largest multiple-of-8 row tile whose double-buffered inputs fit a VMEM budget."""
    budget = 24 * 1024 * 1024  # bytes reserved for the pipelined input buffers
    # Per tile: 2 embedding blocks (native dtype) + 1 label block (lane-padded to 128).
    per_row = 2 * d * itemsize + 128 * 4
    rows = budget // (2 * per_row)          # x2: double buffering
    rows = max(8, min(1024, (rows // 8) * 8))
    if rows >= n:
        return n
    return rows


def contrastive_loss(output1, output2, label, margin=2.0, block_rows=None):
    """Pallas TPU implementation of ContrastiveLoss.forward."""
    n, d = output1.shape
    label2d = label.reshape(n, 1)

    if block_rows is None:
        block_rows = _pick_block_rows(n, d, output1.dtype.itemsize)
    block_rows = min(block_rows, n)
    if block_rows < n and block_rows % 8 != 0:
        raise ValueError("block_rows must be a multiple of 8 when tiling the batch")

    grid = (pl.cdiv(n, block_rows),)
    mask_partial = (n % block_rows) != 0
    margin_arr = jnp.asarray([margin], dtype=jnp.float32)

    kernel = functools.partial(
        _contrastive_kernel,
        n_rows=n,
        block_rows=block_rows,
        mask_partial=mask_partial,
    )

    out = pl.pallas_call(
        kernel,
        out_shape=jax.ShapeDtypeStruct((1,), jnp.float32),
        grid=grid,
        in_specs=[
            pl.BlockSpec(memory_space=pltpu.MemorySpace.SMEM),     # margin (1,)
            pl.BlockSpec((block_rows, d), lambda i: (i, 0)),       # output1 tile
            pl.BlockSpec((block_rows, d), lambda i: (i, 0)),       # output2 tile
            pl.BlockSpec((block_rows, 1), lambda i: (i, 0)),       # label tile
        ],
        out_specs=pl.BlockSpec(memory_space=pltpu.MemorySpace.SMEM),
        scratch_shapes=[pltpu.SMEM((1,), jnp.float32)],            # running sum
        compiler_params=pltpu.CompilerParams(
            dimension_semantics=("arbitrary",),                    # sequential reduction axis
            vmem_limit_bytes=48 * 1024 * 1024,                     # safe on 64 MiB v7x
        ),
    )(margin_arr, output1, output2, label2d)
    return out[0]


def _reference(output1, output2, label, margin=2.0):
    # Pure-JAX reference mirroring the PyTorch module.
    diff = output1.astype(jnp.float32) - output2.astype(jnp.float32) + _EPS
    dist = jnp.sqrt(jnp.sum(diff * diff, axis=1))
    return jnp.mean(label.astype(jnp.float32)
                    * jnp.square(jnp.maximum(margin - dist, 0.0)))


if __name__ == "__main__":
    key = jax.random.PRNGKey(0)
    k1, k2, k3 = jax.random.split(key, 3)

    # Small batch of embedding pairs (single-tile path).
    N, D = 8, 32
    output1 = jax.random.normal(k1, (N, D), dtype=jnp.float32)
    output2 = jax.random.normal(k2, (N, D), dtype=jnp.float32)
    label = jax.random.bernoulli(k3, p=0.5, shape=(N,)).astype(jnp.float32)

    loss = contrastive_loss(output1, output2, label, margin=2.0)
    jax.block_until_ready(loss)
    ref = _reference(output1, output2, label, margin=2.0)
    assert jnp.allclose(loss, ref, atol=1e-5, rtol=1e-5), (loss, ref)

    # Multi-tile path with a masked partial last tile (grid = 3, N not divisible by tile).
    N2, D2 = 20, 32
    ka, kb, kc = jax.random.split(jax.random.PRNGKey(1), 3)
    o1 = jax.random.normal(ka, (N2, D2), dtype=jnp.float32)
    o2 = jax.random.normal(kb, (N2, D2), dtype=jnp.float32)
    lb = jax.random.bernoulli(kc, p=0.5, shape=(N2,)).astype(jnp.float32)
    loss2 = contrastive_loss(o1, o2, lb, margin=2.0, block_rows=8)
    jax.block_until_ready(loss2)
    ref2 = _reference(o1, o2, lb, margin=2.0)
    assert jnp.allclose(loss2, ref2, atol=1e-5, rtol=1e-5), (loss2, ref2)

    # bf16 inputs (native-dtype DMA, f32 in-kernel math).
    N3, D3 = 48, 64
    kd, ke, kf = jax.random.split(jax.random.PRNGKey(2), 3)
    b1 = jax.random.normal(kd, (N3, D3), dtype=jnp.float32).astype(jnp.bfloat16)
    b2 = jax.random.normal(ke, (N3, D3), dtype=jnp.float32).astype(jnp.bfloat16)
    lb3 = jax.random.bernoulli(kf, p=0.5, shape=(N3,)).astype(jnp.float32)
    loss3 = contrastive_loss(b1, b2, lb3, margin=2.0, block_rows=16)
    jax.block_until_ready(loss3)
    ref3 = _reference(b1, b2, lb3, margin=2.0)
    assert jnp.allclose(loss3, ref3, atol=2e-2, rtol=2e-2), (loss3, ref3)

    print("KERNEL_OK")
</pallas_src>

<mosaic_0001>
module attributes {stable_mosaic.version = 11 : i64} {
  func.func @_contrastive_kernel(%arg0: i32, %arg1: memref<1xf32, #tpu.memory_space<smem>>, %arg2: memref<8x32xf32, #tpu.memory_space<vmem>>, %arg3: memref<8x32xf32, #tpu.memory_space<vmem>>, %arg4: memref<8x1xf32, #tpu.memory_space<vmem>>, %arg5: memref<1xf32, #tpu.memory_space<smem>>, %arg6: memref<1xf32, #tpu.memory_space<smem>>) attributes {dimension_semantics = [#tpu.dimension_semantics<arbitrary>], iteration_bounds = array<i64: 1>, scalar_prefetch = 0 : i64, scratch_operands = 1 : i64, tpu.core_type = #tpu.core_type<tc>, window_params = [{transform_indices = @transform_0, window_bounds = array<i64: 1>}, {transform_indices = @transform_1, window_bounds = array<i64: 8, 32>}, {transform_indices = @transform_2, window_bounds = array<i64: 8, 32>}, {transform_indices = @transform_3, window_bounds = array<i64: 8, 1>}, {transform_indices = @transform_4, window_bounds = array<i64: 1>}]} {
    %c0_i32 = arith.constant 0 : i32
    %0 = arith.cmpi eq, %arg0, %c0_i32 : i32
    %1 = arith.extui %0 : i1 to i32
    %c0_i32_0 = arith.constant 0 : i32
    %2 = arith.cmpi ne, %1, %c0_i32_0 : i32
    scf.if %2 {
      %cst_14 = arith.constant 0.000000e+00 : f32
      %c0_15 = arith.constant 0 : index
      %30 = memref.load %arg6[%c0_15] : memref<1xf32, #tpu.memory_space<smem>>
      memref.store %cst_14, %arg6[%c0_15] : memref<1xf32, #tpu.memory_space<smem>>
    } else {
    }
    %c0 = arith.constant 0 : index
    %c0_1 = arith.constant 0 : index
    %3 = vector.load %arg2[%c0, %c0_1] : memref<8x32xf32, #tpu.memory_space<vmem>>, vector<8x32xf32>
    %c0_2 = arith.constant 0 : index
    %c0_3 = arith.constant 0 : index
    %4 = vector.load %arg3[%c0_2, %c0_3] : memref<8x32xf32, #tpu.memory_space<vmem>>, vector<8x32xf32>
    %5 = arith.subf %3, %4 : vector<8x32xf32>
    %cst = arith.constant 9.99999997E-7 : f32
    %6 = vector.broadcast %cst : f32 to vector<8x32xf32>
    %7 = arith.addf %5, %6 : vector<8x32xf32>
    %8 = arith.mulf %7, %7 : vector<8x32xf32>
    %cst_4 = arith.constant dense<0.000000e+00> : vector<8xf32>
    %9 = vector.multi_reduction <add>, %8, %cst_4 [1] : vector<8x32xf32> to vector<8xf32>
    %10 = vector.shape_cast %9 : vector<8xf32> to vector<8x1xf32>
    %11 = math.sqrt %10 : vector<8x1xf32>
    %c0_5 = arith.constant 0 : index
    %12 = memref.load %arg1[%c0_5] : memref<1xf32, #tpu.memory_space<smem>>
    %13 = vector.broadcast %12 : f32 to vector<8x1xf32>
    %14 = arith.subf %13, %11 : vector<8x1xf32>
    %cst_6 = arith.constant 0.000000e+00 : f32
    %15 = vector.broadcast %cst_6 : f32 to vector<8x1xf32>
    %16 = arith.maximumf %14, %15 : vector<8x1xf32>
    %c0_7 = arith.constant 0 : index
    %c0_8 = arith.constant 0 : index
    %17 = vector.load %arg4[%c0_7, %c0_8] : memref<8x1xf32, #tpu.memory_space<vmem>>, vector<8x1xf32>
    %18 = arith.mulf %17, %16 : vector<8x1xf32>
    %19 = arith.mulf %18, %16 : vector<8x1xf32>
    %c0_9 = arith.constant 0 : index
    %20 = memref.load %arg6[%c0_9] : memref<1xf32, #tpu.memory_space<smem>>
    %21 = vector.shape_cast %19 : vector<8x1xf32> to vector<1x8x1xf32>
    %cst_10 = arith.constant dense<0.000000e+00> : vector<1xf32>
    %22 = vector.multi_reduction <add>, %21, %cst_10 [1, 2] : vector<1x8x1xf32> to vector<1xf32>
    %23 = vector.shape_cast %22 : vector<1xf32> to vector<1x1x1xf32>
    %24 = vector.extract %23[0, 0, 0] : f32 from vector<1x1x1xf32>
    %25 = arith.addf %20, %24 : f32
    %c0_11 = arith.constant 0 : index
    %26 = memref.load %arg6[%c0_11] : memref<1xf32, #tpu.memory_space<smem>>
    memref.store %25, %arg6[%c0_11] : memref<1xf32, #tpu.memory_space<smem>>
    %c0_i32_12 = arith.constant 0 : i32
    %27 = arith.cmpi eq, %arg0, %c0_i32_12 : i32
    %28 = arith.extui %27 : i1 to i32
    %c0_i32_13 = arith.constant 0 : i32
    %29 = arith.cmpi ne, %28, %c0_i32_13 : i32
    scf.if %29 {
      %c0_14 = arith.constant 0 : index
      %30 = memref.load %arg6[%c0_14] : memref<1xf32, #tpu.memory_space<smem>>
      %cst_15 = arith.constant 8.000000e+00 : f32
      %31 = arith.divf %30, %cst_15 : f32
      %c0_16 = arith.constant 0 : index
      %32 = memref.load %arg5[%c0_16] : memref<1xf32, #tpu.memory_space<smem>>
      memref.store %31, %arg5[%c0_16] : memref<1xf32, #tpu.memory_space<smem>>
    } else {
    }
    return
  }
  func.func @transform_0(%arg0: i32) -> i32 {
    %c0_i32 = arith.constant 0 : i32
    %c0_i32_0 = arith.constant 0 : i32
    return %c0_i32 : i32
  }
  func.func @transform_1(%arg0: i32) -> (i32, i32) {
    %c0_i32 = arith.constant 0 : i32
    %c0_i32_0 = arith.constant 0 : i32
    return %arg0, %c0_i32 : i32, i32
  }
  func.func @transform_2(%arg0: i32) -> (i32, i32) {
    %c0_i32 = arith.constant 0 : i32
    %c0_i32_0 = arith.constant 0 : i32
    return %arg0, %c0_i32 : i32, i32
  }
  func.func @transform_3(%arg0: i32) -> (i32, i32) {
    %c0_i32 = arith.constant 0 : i32
    %c0_i32_0 = arith.constant 0 : i32
    return %arg0, %c0_i32 : i32, i32
  }
  func.func @transform_4(%arg0: i32) -> i32 {
    %c0_i32 = arith.constant 0 : i32
    %c0_i32_0 = arith.constant 0 : i32
    return %c0_i32 : i32
  }
}

</mosaic_0001>

<bundles_post_ra>
// kernel: tpu_custom_call.1
= control target key start
LH: loop header
LB: loop body
LE: loop exit
PB: predicated region body
PF: predicated region fallthrough
CT: control target
= control target key end

     0   :  { %s152_s0 = inlined_call_operand.<no memory space> [shape: f32[1], index: 0, kind: input, shape index: {}]   ;;  %s153_s1 = inlined_call_operand.vmem [shape: f32[8,32], index: 1, kind: input, shape index: {}]   ;;  %s154_s2 = inlined_call_operand.vmem [shape: f32[8,32], index: 2, kind: input, shape index: {}]   ;;  %s155_s3 = inlined_call_operand.vmem [shape: f32[8,1], index: 3, kind: input, shape index: {}]   ;;  %s156_s4 = inlined_call_operand.hbm [shape: f32[1], index: 4, kind: output, shape index: {}]  }
   0x1   :  { %v25_v0 = vld [vmem:[%s153_s1] sm:$0xff] }
   0x2   :  { %v26_v1 = vld [vmem:[%s154_s2] sm:$0xff] }
   0x3   :  { %10 = vsyncpa [#allocation5], 0  ;;  %v27_v2 = vsub.f32 %v25_v0, %v26_v1  ;;  %vm30_vm0 = vcmask 261120   ;;  %v42_v10 = vstv %s152_s0  ;;  %v45_v14 = vld [vmem:[%s155_s3] sm:$0xff]  ;;  %vm49_vm3 = vcmask 7168   ;;  %s90_s3 = scalar_lea.hbm %s156_s4, 16 }
   0x4   :  { %p91_p0 = scmp.ne.s32.totalorder %s156_s4, %s90_s3  ;;  %p94_p1 = scmp.lt.u32.totalorder %s90_s3, %s156_s4 }
   0x5   :  { %v28_v3 = vadd.f32 1e-06, %v27_v2 }
   0x6   :  { %p96_p2 = pnand %p94_p1, %p91_p0 }
   0x7   :  { %v29_v4 = vmul.f32 %v28_v3, %v28_v3 }
   0x9   :  { %v31_v5 = vsel %vm30_vm0, %v29_v4, 0.0 }
   0xa   :  { %32 = vadd.xlane.f32.xlu0 %v31_v5 }
  0x97   :  { %v33_v6 = vpop.xlane.xlu0 %32 }
  0x98   :  { %88 = vrsqrt.f32 %v33_v6  ;;  %vm36_vm1 = vcmp.eq.f32.partialorder %v33_v6, inf  ;;  %v39_v9 = vand.u32 2147483648, %v33_v6  ;;  %vm38_vm2 = vcmp.eq.f32.partialorder %v33_v6, 0.0 }
  0xa2   :  { %v89_v7 = vpop.eup %88 }
  0xa3   :  { %v35_v8 = vmul.f32 %v89_v7, %v33_v6 }
  0xa5   :  { %v37_v11 = vsel %vm36_vm1, %v33_v6, %v35_v8 }
  0xa6   :  { %v40_v12 = vsel %vm38_vm2, %v39_v9, %v37_v11 }
  0xa7   :  { %v43_v13 = vsub.f32 %v42_v10, %v40_v12 }
  0xa9   :  { %v44_v15 = vmax.f32 %v43_v13, 0.0 }
  0xab   :  { %v46_v16 = vmul.f32 %v45_v14, %v44_v15 }
  0xad   :  { %v47_v17 = vmul.f32 %v46_v16, %v44_v15 }
  0xaf   :  { %v50_v18 = vsel %vm49_vm3, %v47_v17, 0.0 }
  0xb0   :  { %51 = vadd.xlane.f32.xlu0 %v50_v18 }
 0x13d   :  { %v52_v19 = vpop.xlane.xlu0 %51 }
 0x13e   :  { %v53_v20 = vrot.slane %v52_v19, 4 }
 0x140   :  { %v54_v21 = vadd.f32 %v53_v20, %v52_v19 }
 0x142   :  { %v55_v22 = vrot.slane %v54_v21, 2 }
 0x144   :  { %v56_v23 = vadd.f32 %v55_v22, %v54_v21 }
 0x146   :  { %v57_v24 = vrot.slane %v56_v23, 1 }
 0x148   :  { %v58_v25 = vadd.f32 %v57_v24, %v56_v23 }
 0x14a   :  { %85 = vpush %v58_v25 }
 0x17b   :  { %s86_s0 = spop %85 }
 0x17c   :  { %s69_s21 = smul.f32 0.125, %s86_s0 }
 0x17e   :  { %71 = sst [smem:[#allocation4]] %s69_s21 }
 0x17f   :  { %99 = shalt.err (!%p96_p2)
}
 0x180   :  { %s102_s28 = smov [#allocation4]  }
 0x181   :  { %79 = dma.smem_to_hbm %s102_s28, 16, %s156_s4, [#allocation5]  }
 0x182   :  { %100 = dma.done.wait [#allocation5], 16  }
 0x183   :  { %101 = vsyncadd [#allocation5], 4294967280 }
 0x184   :  { %83 = sfence }
 0x185   :  { %84 = vsyncpa [#allocation5], 1 }

</bundles_post_ra>
